<compile_context>
chip_gen: v7x
topology: tpu7x:2x2x1
jax: 0.10.0
libtpu: 0.0.40
codegen_flags: <defaults>
</compile_context>

<pallas_src>
import functools
import math

import jax
import jax.numpy as jnp
import numpy as np
from jax.experimental import pallas as pl
from jax.experimental.pallas import tpu as pltpu


# ----------------------------------------------------------------------------
# Fused kernel: head-batched QKV proj -> RoPE -> attention -> head-batched proj
# ----------------------------------------------------------------------------
def _fused_self_attention_kernel(x_ref, wbig_ref, gain_ref, wproj_ref, o_ref,
                                 *, B, T, H, hd):
    BT = B * T
    C = H * hd

    x = x_ref[...]                                               # (BT, C)
    # Replicate x along a new leading head axis (major-dim broadcast: cheap
    # vreg replication, hoisted once).
    xh = jnp.broadcast_to(x[None], (H, BT, C))                   # (H, BT, C)

    # Head-batched fused projection.  Per-head weight columns are
    #   [ q/sqrt(hd) | rot(q)/sqrt(hd) | k | rot(k) | v ]        -> (H, BT, 5*hd)
    # RoPE pair rotation AND the softmax 1/sqrt(hd) scale were folded into the
    # weights at prepare_params() time (exact transformations).
    qkv = jax.lax.dot_general(xh, wbig_ref[...],
                              (((2,), (1,)), ((0,), (0,))),
                              preferred_element_type=jnp.float32)

    # RoPE: ONE full-width VPU multiply against the fused [cos|sin|cos|sin|1]
    # gain table, then two adds.  q/k come out already scaled for attention.
    qkv = qkv * gain_ref[...]
    q = qkv[..., 0 * hd:1 * hd] + qkv[..., 1 * hd:2 * hd]        # (H, BT, hd)
    k = qkv[..., 2 * hd:3 * hd] + qkv[..., 3 * hd:4 * hd]
    v = qkv[..., 4 * hd:5 * hd]

    # (H, B*T, hd) -> (H*B, T, hd): splits the 16-row sublane dim at an 8-row
    # tile boundary -> pure vreg re-grouping, no transpose / relayout.
    q = q.reshape(H * B, T, hd)
    k = k.reshape(H * B, T, hd)
    v = v.reshape(H * B, T, hd)

    # Batched scaled dot-product attention (non-causal, no mask, no dropout).
    # 'gqd,gkd->gqk': contract shared last dim, leading batch dim (no k.T copy).
    s = jax.lax.dot_general(q, k, (((2,), (2,)), ((0,), (0,))),
                            preferred_element_type=jnp.float32)  # (HB, T, T)
    m = jnp.max(s, axis=-1, keepdims=True)
    e = jnp.exp(s - m)
    p = e * pl.reciprocal(jnp.sum(e, axis=-1, keepdims=True), approx=True)
    # 'gqk,gkd->gqd'
    o = jax.lax.dot_general(p, v, (((2,), (1,)), ((0,), (0,))),
                            preferred_element_type=jnp.float32)  # (HB, T, hd)

    # Output projection batched over heads against the (H, hd, C) weight, then
    # an unrolled sum over the (major) head axis.  No per-head slice/reshape
    # relayouts; the adds are plain full-width VPU ops.
    o = o.reshape(H, BT, hd)                                     # free re-grouping
    y = jax.lax.dot_general(o, wproj_ref[...], (((2,), (1,)), ((0,), (0,))),
                            preferred_element_type=jnp.float32)  # (H, BT, C)
    acc = y[0]
    for h in range(1, H):
        acc = acc + y[h]
    o_ref[...] = acc                                             # (BT, C)


# ----------------------------------------------------------------------------
# One-time parameter preparation (hoisted off the per-call path)
# ----------------------------------------------------------------------------
def prepare_params(w_attn, w_proj, n_head, B, T, base=10000.0):
    """Fold RoPE pair rotation + 1/sqrt(hd) into head-batched QKV weights,
    build the fused [cos|sin|cos|sin|1] gain table, and split the output
    projection per head.  Call once per parameter set (must be regenerated
    whenever w_attn / w_proj change)."""
    three_c, C = w_attn.shape
    assert three_c == 3 * C
    H = n_head
    hd = C // H
    assert hd % 2 == 0
    scale = 1.0 / math.sqrt(hd)

    wq_t = w_attn[0 * C:1 * C, :].T * scale      # (in, out); softmax scale folded
    wk_t = w_attn[1 * C:2 * C, :].T
    wv_t = w_attn[2 * C:3 * C, :].T

    def pair_rotate_fold(wt):
        # Returns wt' such that x @ wt' == rotate_pairs(x @ wt):
        #   out[:, 2i] = -(x@wt)[:, 2i+1],  out[:, 2i+1] = (x@wt)[:, 2i]
        c_in, c_out = wt.shape
        wpair = wt.reshape(c_in, c_out // 2, 2)
        return jnp.stack([-wpair[..., 1], wpair[..., 0]], axis=-1).reshape(c_in, c_out)

    def per_head(wt):                            # (C, C) -> (H, C, hd)
        return wt.reshape(C, H, hd).transpose(1, 0, 2)

    w_big = jnp.concatenate(
        [per_head(wq_t), per_head(pair_rotate_fold(wq_t)),
         per_head(wk_t), per_head(pair_rotate_fold(wk_t)),
         per_head(wv_t)], axis=2)                # (H, C, 5*hd)

    # RoPE tables, interleave-repeated over pairs ([c0,c0,c1,c1,...]); fused
    # with the implicit 'ones' gain for v and tiled over heads/batch rows.
    theta = 1.0 / (base ** (jnp.arange(0, hd, 2, dtype=jnp.float32) / hd))
    ang = jnp.arange(T, dtype=jnp.float32)[:, None] * theta[None, :]   # (T, hd/2)
    cos_t = jnp.repeat(jnp.cos(ang), 2, axis=-1)                       # (T, hd)
    sin_t = jnp.repeat(jnp.sin(ang), 2, axis=-1)
    gain_row = jnp.concatenate(
        [cos_t, sin_t, cos_t, sin_t, jnp.ones_like(cos_t)], axis=-1)   # (T, 5*hd)
    gain = jnp.tile(gain_row[None], (H, B, 1))                         # (H, B*T, 5*hd)

    w_proj_heads = w_proj.T.reshape(H, hd, C)                          # (H, hd, C)

    return {"w_big": w_big, "gain": gain, "w_proj": w_proj_heads}


# ----------------------------------------------------------------------------
# Forward wrapper: single grid-less pallas_call, everything resident in VMEM
# ----------------------------------------------------------------------------
@functools.partial(jax.jit, static_argnames=("n_head",))
def self_attention_forward(x, w_big, gain, w_proj_heads, n_head):
    B, T, C = x.shape
    hd = C // n_head

    kernel = functools.partial(_fused_self_attention_kernel,
                               B=B, T=T, H=n_head, hd=hd)
    vmem = pl.BlockSpec(memory_space=pltpu.MemorySpace.VMEM)  # whole-array blocks

    y2d = pl.pallas_call(
        kernel,
        out_shape=jax.ShapeDtypeStruct((B * T, C), jnp.float32),
        in_specs=[vmem, vmem, vmem, vmem],
        out_specs=vmem,
    )(x.reshape(B * T, C), w_big, gain, w_proj_heads)
    return y2d.reshape(B, T, C)


# ----------------------------------------------------------------------------
# Pure-JAX reference (mirrors the PyTorch forward exactly, default eval path)
# ----------------------------------------------------------------------------
def self_attention_reference(x, w_attn, w_proj, n_head):
    B, T, C = x.shape
    hd = C // n_head
    qkv = x @ w_attn.T
    q, k, v = jnp.split(qkv, 3, axis=2)
    q = q.reshape(B, T, n_head, hd)
    k = k.reshape(B, T, n_head, hd)
    v = v.reshape(B, T, n_head, hd).transpose(0, 2, 1, 3)

    theta = 1.0 / (10000.0 ** (jnp.arange(0, hd, 2, dtype=jnp.float32) / hd))
    ang = jnp.arange(T, dtype=jnp.float32)[:, None] * theta[None, :]  # (T, hd/2)
    cos = jnp.cos(ang)
    sin = jnp.sin(ang)

    def rope(x4):  # [B, T, H, hd]
        xs = x4.reshape(B, T, n_head, hd // 2, 2)
        c = cos[None, :, None, :]
        s = sin[None, :, None, :]
        out = jnp.stack(
            [xs[..., 0] * c - xs[..., 1] * s,
             xs[..., 1] * c + xs[..., 0] * s], axis=-1)
        return out.reshape(B, T, n_head, hd)

    q = rope(q).transpose(0, 2, 1, 3)
    k = rope(k).transpose(0, 2, 1, 3)

    s = jnp.einsum('bhqd,bhkd->bhqk', q, k) * (1.0 / math.sqrt(hd))
    p = jax.nn.softmax(s, axis=-1)
    o = jnp.einsum('bhqk,bhkd->bhqd', p, v)
    o = o.transpose(0, 2, 1, 3).reshape(B, T, C)
    return o @ w_proj.T


# ----------------------------------------------------------------------------
if __name__ == "__main__":
    B, T = 2, 8
    n_dim, n_head = 32, 4

    key = jax.random.PRNGKey(0)
    kx, ka, kp = jax.random.split(key, 3)

    x = jax.random.normal(kx, (B, T, n_dim), dtype=jnp.float32)
    # nn.Linear weights, shape [out, in], no bias — deterministic synthetic init
    bound = 1.0 / math.sqrt(n_dim)
    w_attn = jax.random.uniform(ka, (3 * n_dim, n_dim), jnp.float32, -bound, bound)
    w_proj = jax.random.uniform(kp, (n_dim, n_dim), jnp.float32, -bound, bound)

    # One-time prep (weight/scale/RoPE folding + gain table), off the hot path.
    params = prepare_params(w_attn, w_proj, n_head, B, T)

    y = self_attention_forward(x, params["w_big"], params["gain"],
                               params["w_proj"], n_head=n_head)
    y = jax.block_until_ready(y)

    y_ref = self_attention_reference(x, w_attn, w_proj, n_head)
    # Tolerance accounts for the EUP approximate reciprocal in the softmax
    # (approx=True); any real layout/RoPE/indexing bug would be O(0.1-1).
    np.testing.assert_allclose(np.asarray(y), np.asarray(y_ref),
                               rtol=2e-3, atol=2e-3)

    print("KERNEL_OK")
</pallas_src>

<mosaic_0001>
module attributes {stable_mosaic.version = 11 : i64} {
  func.func @_fused_self_attention_kernel(%arg0: memref<16x32xf32, #tpu.memory_space<vmem>>, %arg1: memref<4x32x40xf32, #tpu.memory_space<vmem>>, %arg2: memref<4x16x40xf32, #tpu.memory_space<vmem>>, %arg3: memref<4x8x32xf32, #tpu.memory_space<vmem>>, %arg4: memref<16x32xf32, #tpu.memory_space<vmem>>) attributes {dimension_semantics = [], scalar_prefetch = 0 : i64, scratch_operands = 0 : i64, tpu.core_type = #tpu.core_type<tc>} {
    %c0 = arith.constant 0 : index
    %c0_0 = arith.constant 0 : index
    %0 = vector.load %arg0[%c0, %c0_0] : memref<16x32xf32, #tpu.memory_space<vmem>>, vector<16x32xf32>
    %1 = vector.shape_cast %0 : vector<16x32xf32> to vector<1x16x32xf32>
    %2 = vector.shape_cast %1 : vector<1x16x32xf32> to vector<1x16x32xf32>
    %3 = vector.broadcast %2 : vector<1x16x32xf32> to vector<4x16x32xf32>
    %c0_1 = arith.constant 0 : index
    %c0_2 = arith.constant 0 : index
    %c0_3 = arith.constant 0 : index
    %4 = vector.load %arg1[%c0_1, %c0_2, %c0_3] : memref<4x32x40xf32, #tpu.memory_space<vmem>>, vector<4x32x40xf32>
    %cst = arith.constant dense<0.000000e+00> : vector<4x16x40xf32>
    %5 = tpu.matmul %3, %4, %cst {dimension_numbers = #tpu.dot_dimension_numbers<[2], [1], [1], [2], [0, 0, 0, 1, 1, 2], [0], [0]>} : vector<4x16x32xf32>, vector<4x32x40xf32>, vector<4x16x40xf32> -> vector<4x16x40xf32>
    %c0_4 = arith.constant 0 : index
    %c0_5 = arith.constant 0 : index
    %c0_6 = arith.constant 0 : index
    %6 = vector.load %arg2[%c0_4, %c0_5, %c0_6] : memref<4x16x40xf32, #tpu.memory_space<vmem>>, vector<4x16x40xf32>
    %7 = arith.mulf %5, %6 : vector<4x16x40xf32>
    %8 = vector.extract_strided_slice %7 {offsets = [0, 0, 0], sizes = [4, 16, 8], strides = [1, 1, 1]} : vector<4x16x40xf32> to vector<4x16x8xf32>
    %9 = vector.extract_strided_slice %7 {offsets = [0, 0, 8], sizes = [4, 16, 8], strides = [1, 1, 1]} : vector<4x16x40xf32> to vector<4x16x8xf32>
    %10 = arith.addf %8, %9 : vector<4x16x8xf32>
    %11 = vector.extract_strided_slice %7 {offsets = [0, 0, 16], sizes = [4, 16, 8], strides = [1, 1, 1]} : vector<4x16x40xf32> to vector<4x16x8xf32>
    %12 = vector.extract_strided_slice %7 {offsets = [0, 0, 24], sizes = [4, 16, 8], strides = [1, 1, 1]} : vector<4x16x40xf32> to vector<4x16x8xf32>
    %13 = arith.addf %11, %12 : vector<4x16x8xf32>
    %14 = vector.extract_strided_slice %7 {offsets = [0, 0, 32], sizes = [4, 16, 8], strides = [1, 1, 1]} : vector<4x16x40xf32> to vector<4x16x8xf32>
    %15 = vector.shape_cast %10 : vector<4x16x8xf32> to vector<8x8x8xf32>
    %16 = vector.shape_cast %13 : vector<4x16x8xf32> to vector<8x8x8xf32>
    %17 = vector.shape_cast %14 : vector<4x16x8xf32> to vector<8x8x8xf32>
    %cst_7 = arith.constant dense<0.000000e+00> : vector<8x8x8xf32>
    %18 = tpu.matmul %15, %16, %cst_7 {dimension_numbers = #tpu.dot_dimension_numbers<[2], [2], [1], [1], [0, 0, 0, 1, 1, 1], [0], [0]>} : vector<8x8x8xf32>, vector<8x8x8xf32>, vector<8x8x8xf32> -> vector<8x8x8xf32>
    %cst_8 = arith.constant dense<0xFF800000> : vector<8x8xf32>
    %19 = vector.multi_reduction <maximumf>, %18, %cst_8 [2] : vector<8x8x8xf32> to vector<8x8xf32>
    %20 = vector.shape_cast %19 : vector<8x8xf32> to vector<8x8x1xf32>
    %21 = vector.broadcast %20 : vector<8x8x1xf32> to vector<8x8x8xf32>
    %22 = arith.subf %18, %21 : vector<8x8x8xf32>
    %23 = math.exp %22 : vector<8x8x8xf32>
    %cst_9 = arith.constant dense<0.000000e+00> : vector<8x8xf32>
    %24 = vector.multi_reduction <add>, %23, %cst_9 [2] : vector<8x8x8xf32> to vector<8x8xf32>
    %25 = vector.shape_cast %24 : vector<8x8xf32> to vector<8x8x1xf32>
    %26 = tpu.reciprocal %25 {approx = true} : vector<8x8x1xf32> -> vector<8x8x1xf32>
    %27 = vector.broadcast %26 : vector<8x8x1xf32> to vector<8x8x8xf32>
    %28 = arith.mulf %23, %27 : vector<8x8x8xf32>
    %cst_10 = arith.constant dense<0.000000e+00> : vector<8x8x8xf32>
    %29 = tpu.matmul %28, %17, %cst_10 {dimension_numbers = #tpu.dot_dimension_numbers<[2], [1], [1], [2], [0, 0, 0, 1, 1, 2], [0], [0]>} : vector<8x8x8xf32>, vector<8x8x8xf32>, vector<8x8x8xf32> -> vector<8x8x8xf32>
    %30 = vector.shape_cast %29 : vector<8x8x8xf32> to vector<4x16x8xf32>
    %c0_11 = arith.constant 0 : index
    %c0_12 = arith.constant 0 : index
    %c0_13 = arith.constant 0 : index
    %31 = vector.load %arg3[%c0_11, %c0_12, %c0_13] : memref<4x8x32xf32, #tpu.memory_space<vmem>>, vector<4x8x32xf32>
    %cst_14 = arith.constant dense<0.000000e+00> : vector<4x16x32xf32>
    %32 = tpu.matmul %30, %31, %cst_14 {dimension_numbers = #tpu.dot_dimension_numbers<[2], [1], [1], [2], [0, 0, 0, 1, 1, 2], [0], [0]>} : vector<4x16x8xf32>, vector<4x8x32xf32>, vector<4x16x32xf32> -> vector<4x16x32xf32>
    %33 = vector.extract_strided_slice %32 {offsets = [0, 0, 0], sizes = [1, 16, 32], strides = [1, 1, 1]} : vector<4x16x32xf32> to vector<1x16x32xf32>
    %34 = vector.shape_cast %33 : vector<1x16x32xf32> to vector<16x32xf32>
    %35 = vector.extract_strided_slice %32 {offsets = [1, 0, 0], sizes = [1, 16, 32], strides = [1, 1, 1]} : vector<4x16x32xf32> to vector<1x16x32xf32>
    %36 = vector.shape_cast %35 : vector<1x16x32xf32> to vector<16x32xf32>
    %37 = arith.addf %34, %36 : vector<16x32xf32>
    %38 = vector.extract_strided_slice %32 {offsets = [2, 0, 0], sizes = [1, 16, 32], strides = [1, 1, 1]} : vector<4x16x32xf32> to vector<1x16x32xf32>
    %39 = vector.shape_cast %38 : vector<1x16x32xf32> to vector<16x32xf32>
    %40 = arith.addf %37, %39 : vector<16x32xf32>
    %41 = vector.extract_strided_slice %32 {offsets = [3, 0, 0], sizes = [1, 16, 32], strides = [1, 1, 1]} : vector<4x16x32xf32> to vector<1x16x32xf32>
    %42 = vector.shape_cast %41 : vector<1x16x32xf32> to vector<16x32xf32>
    %43 = arith.addf %40, %42 : vector<16x32xf32>
    %c0_15 = arith.constant 0 : index
    %c0_16 = arith.constant 0 : index
    %44 = vector.load %arg4[%c0_15, %c0_16] : memref<16x32xf32, #tpu.memory_space<vmem>>, vector<16x32xf32>
    tpu.vector_store %arg4[%c0_15, %c0_16], %43 {strides = array<i32>} : memref<16x32xf32, #tpu.memory_space<vmem>>, vector<16x32xf32>,
    return
  }
}

</mosaic_0001>

<bundles_post_ra>
// kernel: self_attention_forward.1
= control target key start
LH: loop header
LB: loop body
LE: loop exit
PB: predicated region body
PF: predicated region fallthrough
CT: control target
= control target key end

     0   :  { %9 = vsyncpa [#allocation3], 0  ;;  %s2861_s0 = inlined_call_operand.hbm [shape: f32[16,32], index: 0, kind: input, shape index: {}]   ;;  %s2862_s1 = inlined_call_operand.hbm [shape: f32[4,32,40], index: 1, kind: input, shape index: {}]   ;;  %s2863_s2 = inlined_call_operand.hbm [shape: f32[4,16,40], index: 2, kind: input, shape index: {}]   ;;  %s2864_s3 = inlined_call_operand.hbm [shape: f32[4,8,32], index: 3, kind: input, shape index: {}]   ;;  %s2865_s4 = inlined_call_operand.hbm [shape: f32[16,32], index: 4, kind: output, shape index: {}]  }
   0x1   :  { %10 = vsyncpa [#allocation6], 0 }
   0x2   :  { %11 = vsyncpa [#allocation9], 0 }
   0x3   :  { %12 = vsyncpa [#allocation4], 0  ;;  %s2574_s15 = smov [#allocation5]   ;;  %s2575_s17 = smov [#allocation2]  }
   0x4   :  { %s30_s16 = sshll.u32 %s2574_s15, 4  ;;  %s18_s18 = sshll.u32 %s2575_s17, 4  ;;  %s31_s16 = int_to_ptr.vmem [resolvable:$true] %s30_s16  ;;  %s2611_s18 = int_to_ptr.vmem [resolvable:$true] %s18_s18 }
   0x5   :  { %s2456_s21 = scalar_lea.hbm %s2862_s1, 2048 }
   0x6   :  { %p2457_p0 = scmp.ne.s32.totalorder %s2862_s1, %s2456_s21  ;;  %p2460_p1 = scmp.lt.u32.totalorder %s2456_s21, %s2862_s1 }
   0x8   :  { %p2462_p2 = pnand %p2460_p1, %p2457_p0 }
   0xa   :  { %2465 = shalt.err (!%p2462_p2)
}
   0xb   :  { %s2466_s26 = scalar_lea.vmem %s31_s16, 2048  ;;  %p2471_p4 = scmp.lt.s32.totalorder %s31_s16, %s31_s16 }
   0xc   :  { %p2467_p3 = scmp.ne.s32.totalorder %s31_s16, %s2466_s26  ;;  %p2472_p5 = scmp.lt.s32.totalorder %s2466_s26, %s2466_s26 }
   0xe   :  { %p2473_p6 = por %p2472_p5, %p2471_p4 }
  0x10   :  { %p2474_p7 = pnand %p2473_p6, %p2467_p3 }
  0x12   :  { %2477 = shalt.err (!%p2474_p7)
}
  0x13   :  { %s2576_s27 = smov 128   ;;  %s2577_s28 = smov 8  }
  0x14   :  { %36 = dma.hbm_to_vmem [thread:$0]  %s2862_s1, 2048, %s31_s16, [#allocation6], %s2576_s27, %s2576_s27, %s2577_s28  }
  0x15   :  { %s2478_s7 = scalar_lea.hbm %s2861_s0, 256 }
  0x16   :  { %p2479_p8 = scmp.ne.s32.totalorder %s2861_s0, %s2478_s7  ;;  %p2482_p9 = scmp.lt.u32.totalorder %s2478_s7, %s2861_s0 }
  0x18   :  { %p2484_p10 = pnand %p2482_p9, %p2479_p8 }
  0x1a   :  { %2487 = shalt.err (!%p2484_p10)
}
  0x1b   :  { %s2488_s12 = scalar_lea.vmem %s2611_s18, 256  ;;  %p2493_p12 = scmp.lt.s32.totalorder %s2611_s18, %s2611_s18 }
  0x1c   :  { %p2489_p11 = scmp.ne.s32.totalorder %s2611_s18, %s2488_s12  ;;  %p2494_p13 = scmp.lt.s32.totalorder %s2488_s12, %s2488_s12 }
  0x1e   :  { %p2495_p0 = por %p2494_p13, %p2493_p12 }
  0x20   :  { %p2496_p1 = pnand %p2495_p0, %p2489_p11 }
  0x22   :  { %2499 = shalt.err (!%p2496_p1)
}
  0x23   :  { %24 = dma.hbm_to_vmem [thread:$0]  %s2861_s0, 256, %s2611_s18, [#allocation3], %s2576_s27, %s2576_s27, %s2577_s28  }
  0x24   :  { %s2578_s14 = smov [#allocation7]   ;;  %s2579_s16 = smov [#allocation8]  }
  0x25   :  { %s42_s15 = sshll.u32 %s2578_s14, 4  ;;  %s54_s17 = sshll.u32 %s2579_s16, 4  ;;  %s43_s15 = int_to_ptr.vmem [resolvable:$true] %s42_s15  ;;  %s2648_s17 = int_to_ptr.vmem [resolvable:$true] %s54_s17 }
  0x26   :  { %s2500_s21 = scalar_lea.hbm %s2863_s2, 1024 }
  0x27   :  { %p2501_p2 = scmp.ne.s32.totalorder %s2863_s2, %s2500_s21  ;;  %p2504_p3 = scmp.lt.u32.totalorder %s2500_s21, %s2863_s2 }
  0x29   :  { %p2506_p4 = pnand %p2504_p3, %p2501_p2 }
  0x2b   :  { %2509 = shalt.err (!%p2506_p4)
}
  0x2c   :  { %s2510_s0 = scalar_lea.vmem %s43_s15, 1024  ;;  %p2515_p6 = scmp.lt.s32.totalorder %s43_s15, %s43_s15 }
  0x2d   :  { %p2511_p5 = scmp.ne.s32.totalorder %s43_s15, %s2510_s0  ;;  %p2516_p7 = scmp.lt.s32.totalorder %s2510_s0, %s2510_s0 }
  0x2f   :  { %p2517_p8 = por %p2516_p7, %p2515_p6 }
  0x31   :  { %p2518_p9 = pnand %p2517_p8, %p2511_p5 }
  0x33   :  { %2521 = shalt.err (!%p2518_p9)
}
  0x34   :  { %48 = dma.hbm_to_vmem [thread:$0]  %s2863_s2, 1024, %s43_s15, [#allocation6], %s2576_s27, %s2576_s27, %s2577_s28  }
  0x35   :  { %s2522_s5 = scalar_lea.hbm %s2864_s3, 512 }
  0x36   :  { %p2523_p10 = scmp.ne.s32.totalorder %s2864_s3, %s2522_s5  ;;  %p2526_p11 = scmp.lt.u32.totalorder %s2522_s5, %s2864_s3 }
  0x38   :  { %p2528_p12 = pnand %p2526_p11, %p2523_p10 }
  0x3a   :  { %2531 = shalt.err (!%p2528_p12)
}
  0x3b   :  { %s2532_s10 = scalar_lea.vmem %s2648_s17, 512  ;;  %p2537_p0 = scmp.lt.s32.totalorder %s2648_s17, %s2648_s17 }
  0x3c   :  { %p2533_p13 = scmp.ne.s32.totalorder %s2648_s17, %s2532_s10  ;;  %p2538_p1 = scmp.lt.s32.totalorder %s2532_s10, %s2532_s10 }
  0x3e   :  { %p2539_p2 = por %p2538_p1, %p2537_p0 }
  0x40   :  { %p2540_p3 = pnand %p2539_p2, %p2533_p13 }
  0x42   :  { %2543 = shalt.err (!%p2540_p3)
}
  0x43   :  { %60 = dma.hbm_to_vmem [thread:$0]  %s2864_s3, 512, %s2648_s17, [#allocation9], %s2576_s27, %s2576_s27, %s2577_s28  }
  0x44   :  { %2566 = dma.done.wait [#allocation3], 256  }
  0x45   :  { %2567 = vsyncadd [#allocation3], 4294967040 }
  0x46   :  { %2568 = dma.done.wait [#allocation6], 3072  }
  0x47   :  { %2569 = vsyncadd [#allocation6], 4294964224 }
  0x48   :  { %2570 = dma.done.wait [#allocation9], 512  }
  0x49   :  { %2571 = vsyncadd [#allocation9], 4294966784  ;;  %vm91_vm0 = vcmask 261120   ;;  %v75_v0 = vld [vmem:[#allocation5] sm:$0xff]  ;;  %v76_v1 = vld [vmem:[#allocation5 + $0x8] sm:$0xff]  ;;  %s2580_s3 = smov 120  }
  0x4a   :  { %v77_v2 = vld [vmem:[#allocation5 + $0x10] sm:$0xff]  ;;  %v2374_v3 = vpack.c.bf16 %v76_v1, %v75_v0  ;;  %v78_v4 = vld [vmem:[#allocation5 + $0x18] sm:$0xff]  ;;  %v79_v7 = vld [vmem:[#allocation5 + $0x20] sm:$0xff]  ;;  %v2581_v49 = vmov 0.0   ;;  %vm2582_vm1 = vmmov 0   ;;  %s2583_s12 = smov 112  }
  0x4b   :  { %v73_v5 = vld [vmem:[#allocation2] sm:$0xff]  ;;  %v2378_v6 = vpack.c.bf16 %v78_v4, %v77_v2  ;;  %v80_v8 = vld [vmem:[#allocation5 + $0x28] sm:$0xff]  ;;  %v83_v9 = vld [vmem:[#allocation5 + $0x40] sm:$0xff]  ;;  %s2584_s1 = smov 96   ;;  %vm457_vm2 = vcmask 64512   ;;  %s2585_s13 = smov [#allocation10]  }
  0x4c   :  { %2238 = vmatprep.mubr.msk.f32.mxu1 %vm91_vm0, %v73_v5  ;;  %2260 = vmatprep.mubr.msk.f32.mxu0 %vm91_vm0, %v73_v5  ;;  %v84_v10 = vld [vmem:[#allocation5 + $0x48] sm:$0xff]  ;;  %v85_v12 = vld [vmem:[#allocation5 + $0x50] sm:$0xff]  ;;  %v86_v13 = vld [vmem:[#allocation5 + $0x58] sm:$0xff]  ;;  %v2382_v14 = vpack.c.bf16 %v80_v8, %v79_v7  ;;  %s2108_s14 = sshll.u32 %s2585_s13, 4  ;;  %s2109_s14 = int_to_ptr.vmem [resolvable:$true] %s2108_s14 }
  0x4d   :  { %2375 = vmatprep.subr.bf16.mxu1 %v2374_v3  ;;  %v2390_v11 = vpack.c.bf16 %v84_v10, %v83_v9  ;;  %v2394_v15 = vpack.c.bf16 %v86_v13, %v85_v12  ;;  %v81_v16 = vld [vmem:[#allocation5 + $0x30] sm:$0xff]  ;;  %v82_v17 = vld [vmem:[#allocation5 + $0x38] sm:$0xff]  ;;  %v87_v20 = vld [vmem:[#allocation5 + $0x60] sm:$0xff]  ;;  %s2544_s15 = scalar_lea.vmem %s2109_s14, 256  ;;  %p2549_p5 = scmp.lt.s32.totalorder %s2109_s14, %s2109_s14 }
  0x4e   :  { %2377 = vmatpush3.bf16.msra.mxu1 %v2374_v3  ;;  %v74_v18 = vld [vmem:[#allocation2 + $0x8] sm:$0xff]  ;;  %v2386_v19 = vpack.c.bf16 %v82_v17, %v81_v16  ;;  %v88_v21 = vld [vmem:[#allocation5 + $0x68] sm:$0xff]  ;;  %v89_v23 = vld [vmem:[#allocation5 + $0x70] sm:$0xff]  ;;  %p2545_p4 = scmp.ne.s32.totalorder %s2109_s14, %s2544_s15  ;;  %p2550_p6 = scmp.lt.s32.totalorder %s2544_s15, %s2544_s15 }
  0x4f   :  { %2379 = vmatprep.subr.bf16.mxu1 %v2378_v6  ;;  %2391 = vmatprep.subr.bf16.mxu0 %v2390_v11  ;;  %v2398_v22 = vpack.c.bf16 %v88_v21, %v87_v20  ;;  %v90_v24 = vld [vmem:[#allocation5 + $0x78] sm:$0xff]  ;;  %v398_v26 = vld [vmem:[#allocation7] sm:$0xff]  ;;  %v399_v30 = vld [vmem:[#allocation7 + $0x8] sm:$0xff] }
  0x50   :  { %2393 = vmatpush3.bf16.msra.mxu0 %v2390_v11  ;;  %v2402_v25 = vpack.c.bf16 %v90_v24, %v89_v23  ;;  %v402_v33 = vld [vmem:[#allocation7 + $0x20] sm:$0xff]  ;;  %v400_v35 = vld [vmem:[#allocation7 + $0x10] sm:$0xff]  ;;  %v401_v40 = vld [vmem:[#allocation7 + $0x18] sm:$0xff]  ;;  %p2551_p7 = por %p2550_p6, %p2549_p5 }
  0x51   :  { %2395 = vmatprep.subr.bf16.mxu0 %v2394_v15  ;;  %v403_v41 = vld [vmem:[#allocation7 + $0x28] sm:$0xff]  ;;  %v404_v43 = vld [vmem:[#allocation7 + $0x30] sm:$0xff]  ;;  %v405_v46 = vld [vmem:[#allocation7 + $0x38] sm:$0xff] }
  0x52   :  { %2381 = vmatpush3.bf16.msra.mxu1 %v2378_v6  ;;  %p2552_p8 = pnand %p2551_p7, %p2545_p4 }
  0x53   :  { %2383 = vmatprep.subr.bf16.mxu1 %v2382_v14 }
  0x54   :  { %2397 = vmatpush3.bf16.msra.mxu0 %v2394_v15 }
  0x55   :  { %2239 = vmatmul.mubr.msk.f32.vlgmr.msra.gmra.mrb[0].mxu1 %vm91_vm0, %v74_v18  ;;  %2274 = vmatprep.subr.mxu0 %v2581_v49 }
  0x56   :  { %2385 = vmatpush3.bf16.msra.mxu1 %v2382_v14  ;;  %2249 = vmatprep.mubr.msk.f32.mxu1 %vm91_vm0, %v73_v5 }
  0x57   :  { %2387 = vmatprep.subr.bf16.mxu1 %v2386_v19  ;;  %2261 = vmatmul.mubr.msk.f32.vlgmr.msra.gmra.mrb[0].mxu0 %vm91_vm0, %v74_v18 }
  0x58   :  { %2276 = vmatprep.mubr.msk.f32.mxu0 %vm2582_vm1, %v2581_v49 }
  0x5a   :  { %2389 = vmatpush3.bf16.msra.mxu1 %v2386_v19 }
  0x5b   :  { %2399 = vmatprep.subr.bf16.mxu1 %v2398_v22 }
  0x5d   :  { %2250 = vmatmul.mubr.msk.f32.vlgmr.msra.gmra.mrb[2].mxu1 %vm91_vm0, %v74_v18 }
  0x5e   :  { %2401 = vmatpush3.bf16.msra.mxu1 %v2398_v22  ;;  %2271 = vmatprep.mubr.msk.f32.mxu1 %vm91_vm0, %v73_v5 }
  0x5f   :  { %2403 = vmatprep.subr.bf16.mxu1 %v2402_v25 }
  0x62   :  { %2405 = vmatpush3.bf16.msra.mxu1 %v2402_v25 }
  0x63   :  { %2279 = vmatprep.subr.mxu1 %v2581_v49 }
  0x65   :  { %2272 = vmatmul.mubr.msk.f32.vlgmr.msra.gmra.mrb[4].mxu1 %vm91_vm0, %v74_v18 }
  0x66   :  { %2281 = vmatprep.mubr.msk.f32.mxu1 %vm2582_vm1, %v2581_v49 }
 0x128   :  { %v2240_v27 = vpop.f32.mrb[0].mxu1 }
 0x129   :  { %v164_v28 = vpop.f32.mrb[1].mxu1  ;;  %v2693_v34 = vmul.f32 %v2240_v27, %v399_v30 }
 0x12a   :  { %v406_v29 = vmul.f32 %v398_v26, %v164_v28  ;;  %v2262_v31 = vpop.f32.mrb[0].mxu0 }
 0x12b   :  { %v314_v32 = vpop.f32.mrb[1].mxu0  ;;  %v2704_v44 = vmul.f32 %v2262_v31, %v403_v41 }
 0x12c   :  { %422 = vrot.lane.b32.xlu0 %v406_v29, %s2580_s3  ;;  %v2696_v37 = vmul.f32 %v402_v33, %v314_v32 }
 0x130   :  { %424 = vrot.lane.b32.xlu0 %v2693_v34, %s2580_s3  ;;  %v2251_v36 = vpop.f32.mrb[2].mxu1 }
 0x131   :  { %v239_v38 = vpop.f32.mrb[3].mxu1  ;;  %v2702_v42 = vmul.f32 %v2251_v36, %v401_v40 }
 0x132   :  { %v2698_v39 = vmul.f32 %v400_v35, %v239_v38 }
 0x134   :  { %430 = vrot.lane.b32.xlu0 %v2696_v37, %s2580_s3  ;;  %426 = vrot.lane.b32.xlu1 %v2698_v39, %s2580_s3 }
 0x138   :  { %428 = vrot.lane.b32.xlu1 %v2702_v42, %s2580_s3  ;;  %v2273_v45 = vpop.f32.mrb[4].mxu1 }
 0x139   :  { %v389_v47 = vpop.f32.mrb[5].mxu1  ;;  %v2711_v50 = vmul.f32 %v2273_v45, %v405_v46 }
 0x13a   :  { %v2707_v48 = vmul.f32 %v404_v43, %v389_v47 }
 0x13c   :  { %432 = vrot.lane.b32.xlu1 %v2704_v44, %s2580_s3  ;;  %434 = vrot.lane.b32.xlu0 %v2707_v48, %s2580_s3 }
 0x140   :  { %436 = vrot.lane.b32.xlu1 %v2711_v50, %s2580_s3 }
 0x19e   :  { %v423_v51 = vpop.permute.xlu0 %422 }
 0x19f   :  { %v446_v52 = vadd.f32 %v423_v51, %v406_v29 }
 0x1a1   :  { %455 = vrot.lane.b32.xlu0 %v446_v52, %s2583_s12 }
 0x1a2   :  { %v425_v53 = vpop.permute.xlu0 %424 }
 0x1a3   :  { %v447_v54 = vadd.f32 %v425_v53, %v2693_v34 }
 0x1a5   :  { %533 = vrot.lane.b32.xlu1 %v447_v54, %s2583_s12 }
 0x1a6   :  { %v427_v55 = vpop.permute.xlu1 %426  ;;  %v431_v57 = vpop.permute.xlu0 %430 }
 0x1a7   :  { %v448_v56 = vadd.f32 %v427_v55, %v2698_v39  ;;  %v450_v59 = vadd.f32 %v431_v57, %v2696_v37 }
 0x1a9   :  { %610 = vrot.lane.b32.xlu0 %v448_v56, %s2583_s12 }
 0x1aa   :  { %v429_v58 = vpop.permute.xlu1 %428 }
 0x1ab   :  { %v449_v60 = vadd.f32 %v429_v58, %v2702_v42 }
 0x1ad   :  { %687 = vrot.lane.b32.xlu1 %v449_v60, %s2583_s12  ;;  %764 = vrot.lane.b32.xlu0 %v450_v59, %s2583_s12 }
 0x1ae   :  { %v433_v61 = vpop.permute.xlu1 %432  ;;  %v435_v62 = vpop.permute.xlu0 %434 }
 0x1af   :  { %v451_v63 = vadd.f32 %v433_v61, %v2704_v44  ;;  %v452_v0 = vadd.f32 %v435_v62, %v2707_v48 }
 0x1b1   :  { %841 = vrot.lane.b32.xlu1 %v451_v63, %s2583_s12  ;;  %918 = vrot.lane.b32.xlu0 %v452_v0, %s2583_s12 }
 0x1b2   :  { %v437_v1 = vpop.permute.xlu1 %436 }
 0x1b3   :  { %v453_v2 = vadd.f32 %v437_v1, %v2711_v50 }
 0x1b5   :  { %995 = vrot.lane.b32.xlu1 %v453_v2, %s2583_s12 }
 0x1b9   :  { %1159 = vrot.lane.b32.xlu1 %v406_v29, %s2584_s1 }
 0x213   :  { %v456_v3 = vpop.permute.xlu0 %455 }
 0x214   :  { %2275 = vmatpush3.xpose.msk.msra.mxu0 %vm457_vm2, %v456_v3 }
 0x215   :  { %2284 = vmatprep.subr.mxu0 %v2581_v49 }
 0x217   :  { %v534_v4 = vpop.permute.xlu1 %533  ;;  %2277 = vmatmul.mubr.msk.f32.vlgmr.msra.gmra.mrb[2].mxu0 %vm457_vm2, %v446_v52 }
 0x218   :  { %2280 = vmatpush3.xpose.msk.msra.mxu1 %vm457_vm2, %v534_v4  ;;  %2286 = vmatprep.mubr.msk.f32.mxu0 %vm2582_vm1, %v2581_v49 }
 0x219   :  { %2289 = vmatprep.subr.mxu1 %v2581_v49 }
 0x21b   :  { %2282 = vmatmul.mubr.msk.f32.vlgmr.msra.gmra.mrb[6].mxu1 %vm457_vm2, %v447_v54  ;;  %v611_v5 = vpop.permute.xlu0 %610 }
 0x21c   :  { %2285 = vmatpush3.xpose.msk.msra.mxu0 %vm457_vm2, %v611_v5  ;;  %2291 = vmatprep.mubr.msk.f32.mxu1 %vm2582_vm1, %v2581_v49 }
 0x21d   :  { %2294 = vmatprep.subr.mxu0 %v2581_v49 }
 0x21f   :  { %v688_v6 = vpop.permute.xlu1 %687  ;;  %2287 = vmatmul.mubr.msk.f32.vlgmr.msra.gmra.mrb[4].mxu0 %vm457_vm2, %v448_v56  ;;  %v765_v7 = vpop.permute.xlu0 %764 }
 0x220   :  { %2290 = vmatpush3.xpose.msk.msra.mxu1 %vm457_vm2, %v688_v6  ;;  %2295 = vmatpush3.xpose.msk.msra.mxu0 %vm457_vm2, %v765_v7 }
 0x221   :  { %2296 = vmatprep.mubr.msk.f32.mxu0 %vm2582_vm1, %v2581_v49  ;;  %2299 = vmatprep.subr.mxu1 %v2581_v49 }
 0x222   :  { %2304 = vmatprep.subr.mxu0 %v2581_v49 }
 0x223   :  { %2292 = vmatmul.mubr.msk.f32.vlgmr.msra.gmra.mrb[8].mxu1 %vm457_vm2, %v449_v60  ;;  %v842_v8 = vpop.permute.xlu1 %841  ;;  %2297 = vmatmul.mubr.msk.f32.vlgmr.msra.gmra.mrb[6].mxu0 %vm457_vm2, %v450_v59  ;;  %v919_v9 = vpop.permute.xlu0 %918 }
 0x224   :  { %2300 = vmatpush3.xpose.msk.msra.mxu1 %vm457_vm2, %v842_v8  ;;  %2305 = vmatpush3.xpose.msk.msra.mxu0 %vm457_vm2, %v919_v9 }
 0x225   :  { %2301 = vmatprep.mubr.msk.f32.mxu1 %vm2582_vm1, %v2581_v49  ;;  %2306 = vmatprep.mubr.msk.f32.mxu0 %vm2582_vm1, %v2581_v49 }
 0x226   :  { %2309 = vmatprep.subr.mxu1 %v2581_v49  ;;  %2314 = vmatprep.subr.mxu0 %v2581_v49 }
 0x227   :  { %2302 = vmatmul.mubr.msk.f32.vlgmr.msra.gmra.mrb[10].mxu1 %vm457_vm2, %v451_v63  ;;  %v996_v10 = vpop.permute.xlu1 %995  ;;  %2307 = vmatmul.mubr.msk.f32.vlgmr.msra.gmra.mrb[8].mxu0 %vm457_vm2, %v452_v0 }
 0x228   :  { %2310 = vmatpush3.xpose.msk.msra.mxu1 %vm457_vm2, %v996_v10  ;;  %2311 = vmatprep.mubr.msk.f32.mxu1 %vm2582_vm1, %v2581_v49 }
 0x229   :  { %2319 = vmatprep.subr.mxu1 %v2581_v49  ;;  %2316 = vmatprep.mubr.msk.f32.mxu0 %vm2582_vm1, %v2581_v49 }
 0x22b   :  { %2312 = vmatmul.mubr.msk.f32.vlgmr.msra.gmra.mrb[12].mxu1 %vm457_vm2, %v453_v2  ;;  %v1160_v11 = vpop.permute.xlu1 %1159 }
 0x22c   :  { %2315 = vmatpush3.msra.mxu0 %v1160_v11  ;;  %2321 = vmatprep.mubr.msk.f32.mxu1 %vm2582_vm1, %v2581_v49 }
 0x22d   :  { %2324 = vmatprep.subr.mxu0 %v2581_v49 }
 0x2ea   :  { %v528_v12 = vpop.f32.mrb[2].mxu0 }
 0x2eb   :  { %v2278_v13 = vpop.f32.mrb[3].mxu0  ;;  %v1071_v14 = vsel %vm457_vm2, %v528_v12, -inf }
 0x2ec   :  { %1072 = vmax.xlane.f32.xlu0 %v1071_v14 }
 0x2ee   :  { %v605_v15 = vpop.f32.mrb[6].mxu1 }
 0x2ef   :  { %v2283_v16 = vpop.f32.mrb[7].mxu1  ;;  %v1074_v17 = vsel %vm457_vm2, %v605_v15, -inf }
 0x2f0   :  { %1075 = vmax.xlane.f32.xlu1 %v1074_v17 }
 0x2f2   :  { %v682_v18 = vpop.f32.mrb[4].mxu0 }
 0x2f3   :  { %v2288_v19 = vpop.f32.mrb[5].mxu0  ;;  %v1077_v30 = vsel %vm457_vm2, %v682_v18, -inf }
 0x2f6   :  { %v759_v20 = vpop.f32.mrb[8].mxu1  ;;  %v836_v21 = vpop.f32.mrb[6].mxu0 }
 0x2f7   :  { %v2293_v22 = vpop.f32.mrb[9].mxu1  ;;  %v2298_v23 = vpop.f32.mrb[7].mxu0  ;;  %v1080_v24 = vsel %vm457_vm2, %v759_v20, -inf  ;;  %v1083_v25 = vsel %vm457_vm2, %v836_v21, -inf }
 0x2f8   :  { %1081 = vmax.xlane.f32.xlu0 %v1080_v24  ;;  %1084 = vmax.xlane.f32.xlu1 %v1083_v25 }
 0x2fa   :  { %v913_v26 = vpop.f32.mrb[10].mxu1  ;;  %v990_v27 = vpop.f32.mrb[8].mxu0 }
 0x2fb   :  { %v2303_v28 = vpop.f32.mrb[11].mxu1  ;;  %v2308_v29 = vpop.f32.mrb[9].mxu0  ;;  %v1086_v33 = vsel %vm457_vm2, %v913_v26, -inf  ;;  %v1089_v36 = vsel %vm457_vm2, %v990_v27, -inf }
 0x2fc   :  { %1078 = vmax.xlane.f32.xlu0 %v1077_v30 }
 0x2fe   :  { %v1067_v31 = vpop.f32.mrb[12].mxu1 }
 0x2ff   :  { %v2313_v32 = vpop.f32.mrb[13].mxu1  ;;  %v1092_v35 = vsel %vm457_vm2, %v1067_v31, -inf }
 0x300   :  { %1087 = vmax.xlane.f32.xlu0 %v1086_v33 }
 0x304   :  { %1093 = vmax.xlane.f32.xlu0 %v1092_v35 }
 0x309   :  { %1311 = vrot.lane.b32.xlu1 %v2698_v39, %s2584_s1 }
 0x31a   :  { %1235 = vrot.lane.b32.xlu0 %v2693_v34, %s2584_s1 }
 0x32d   :  { %1090 = vmax.xlane.f32.xlu1 %v1089_v36 }
 0x33e   :  { %1387 = vrot.lane.b32.xlu1 %v2702_v42, %s2584_s1 }
 0x379   :  { %v1073_v38 = vpop.xlane.xlu0 %1072 }
 0x37a   :  { %v1095_v40 = vsub.f32 %v528_v12, %v1073_v38 }
 0x37c   :  { %v1103_v41 = vmul.f32 1.442695, %v1095_v40 }
 0x37d   :  { %v1076_v43 = vpop.xlane.xlu1 %1075 }
 0x37e   :  { %2424 = vpow2.f32 %v1103_v41  ;;  %v1096_v45 = vsub.f32 %v605_v15, %v1076_v43 }
 0x380   :  { %v1105_v46 = vmul.f32 1.442695, %v1096_v45 }
 0x382   :  { %2426 = vpow2.f32 %v1105_v46 }
 0x385   :  { %v1082_v47 = vpop.xlane.xlu0 %1081  ;;  %v1085_v61 = vpop.xlane.xlu1 %1084 }
 0x386   :  { %v1098_v51 = vsub.f32 %v759_v20, %v1082_v47  ;;  %v1099_v62 = vsub.f32 %v836_v21, %v1085_v61 }
 0x388   :  { %v2425_v39 = vpop.eup %2424  ;;  %v1109_v52 = vmul.f32 1.442695, %v1098_v51  ;;  %v1111_v0 = vmul.f32 1.442695, %v1099_v62 }
 0x389   :  { %v1079_v53 = vpop.xlane.xlu0 %1078  ;;  %v1119_v34 = vsel %vm457_vm2, %v2425_v39, 0.0  ;;  %v1312_v1 = vpop.permute.xlu1 %1311 }
 0x38a   :  { %1120 = vadd.xlane.f32.xlu1 %v1119_v34  ;;  %2428 = vpow2.f32 %v1109_v52  ;;  %v1097_v60 = vsub.f32 %v682_v18, %v1079_v53  ;;  %v1768_v52 = vld [vmem:[#allocation8 + $0x8] sm:$0xff] }
 0x38c   :  { %v2427_v54 = vpop.eup %2426  ;;  %v1107_v63 = vmul.f32 1.442695, %v1097_v60 }
 0x38d   :  { %v1088_v55 = vpop.xlane.xlu0 %1087  ;;  %v1122_v42 = vsel %vm457_vm2, %v2427_v54, 0.0 }
 0x38e   :  { %1123 = vadd.xlane.f32.xlu0 %v1122_v42  ;;  %2430 = vpow2.f32 %v1107_v63  ;;  %v1100_v2 = vsub.f32 %v913_v26, %v1088_v55  ;;  %v1769_v55 = vld [vmem:[#allocation8 + $0x10] sm:$0xff] }
 0x38f   :  { %2432 = vpow2.f32 %v1111_v0 }
 0x390   :  { %v1113_v3 = vmul.f32 1.442695, %v1100_v2 }
 0x391   :  { %v1094_v56 = vpop.xlane.xlu0 %1093 }
 0x392   :  { %v1102_v4 = vsub.f32 %v1067_v31, %v1094_v56  ;;  %2434 = vpow2.f32 %v1113_v3 }
 0x394   :  { %v2785_v57 = vpop.eup %2428 }
 0x395   :  { %v1236_v58 = vpop.permute.xlu0 %1235  ;;  %v1128_v59 = vsel %vm457_vm2, %v2785_v57, 0.0 }
 0x396   :  { %2320 = vmatpush3.msra.mxu1 %v1236_v58  ;;  %1129 = vadd.xlane.f32.xlu0 %v1128_v59  ;;  %v1770_v59 = vld [vmem:[#allocation8 + $0x18] sm:$0xff] }
 0x397   :  { %2329 = vmatprep.subr.mxu1 %v2581_v49 }
 0x398   :  { %v2431_v6 = vpop.eup %2430 }
 0x399   :  { %v1125_v9 = vsel %vm457_vm2, %v2431_v6, 0.0  ;;  %v2433_v10 = vpop.eup %2432 }
 0x39b   :  { %1539 = vrot.lane.b32.xlu1 %v2704_v44, %s2584_s1  ;;  %v1117_v44 = vmul.f32 1.442695, %v1102_v4 }
 0x39c   :  { %v2796_v11 = vpop.eup %2434 }
 0x39d   :  { %v1134_v14 = vsel %vm457_vm2, %v2796_v11, 0.0 }
 0x3ac   :  { %1463 = vrot.lane.b32.xlu0 %v2696_v37, %s2584_s1  ;;  %v1131_v37 = vsel %vm457_vm2, %v2433_v10, 0.0 }
 0x3ba   :  { %v1091_v5 = vpop.xlane.xlu1 %1090 }
 0x3bb   :  { %v1101_v7 = vsub.f32 %v990_v27, %v1091_v5 }
 0x3bd   :  { %v1115_v8 = vmul.f32 1.442695, %v1101_v7 }
 0x3be   :  { %v1388_v17 = vpop.permute.xlu1 %1387 }
 0x3bf   :  { %2436 = vpow2.f32 %v1115_v8  ;;  %1126 = vadd.xlane.f32.xlu1 %v1125_v9 }
 0x3c0   :  { %2438 = vpow2.f32 %v1117_v44 }
 0x3c3   :  { %1132 = vadd.xlane.f32.xlu1 %v1131_v37 }
 0x3c9   :  { %v2437_v12 = vpop.eup %2436 }
 0x3ca   :  { %v1137_v13 = vsel %vm457_vm2, %v2437_v12, 0.0  ;;  %v2801_v15 = vpop.eup %2438 }
 0x3cb   :  { %1138 = vadd.xlane.f32.xlu1 %v1137_v13  ;;  %1135 = vadd.xlane.f32.xlu0 %v1134_v14  ;;  %v1140_v16 = vsel %vm457_vm2, %v2801_v15, 0.0 }
 0x3cf   :  { %1141 = vadd.xlane.f32.xlu0 %v1140_v16 }
 0x3dc   :  { %1691 = vrot.lane.b32.xlu1 %v2711_v50, %s2584_s1 }
 0x3e5   :  { %1615 = vrot.lane.b32.xlu0 %v2707_v48, %s2584_s1 }
 0x417   :  { %v1121_v18 = vpop.xlane.xlu1 %1120 }
 0x418   :  { %2440 = vrcp.f32 %v1121_v18 }
 0x41b   :  { %v1124_v19 = vpop.xlane.xlu0 %1123  ;;  %v1540_v25 = vpop.permute.xlu1 %1539 }
 0x41c   :  { %2442 = vrcp.f32 %v1124_v19 }
 0x422   :  { %v2441_v20 = vpop.eup %2440 }
 0x423   :  { %v1151_v21 = vmul.f32 %v2441_v20, %v2425_v39  ;;  %v1130_v22 = vpop.xlane.xlu0 %1129  ;;  %v1767_v39 = vld [vmem:[#allocation8] sm:$0xff] }
 0x424   :  { %2444 = vrcp.f32 %v1130_v22 }
 0x425   :  { %2317 = vmatmul.mubr.msk.f32.vlgmr.msra.gmra.mrb[10].mxu0 %vm457_vm2, %v1151_v21 }
 0x426   :  { %v2443_v23 = vpop.eup %2442  ;;  %2325 = vmatpush3.msra.mxu0 %v1312_v1  ;;  %2326 = vmatprep.mubr.msk.f32.mxu0 %vm2582_vm1, %v2581_v49 }
 0x427   :  { %v1152_v50 = vmul.f32 %v2443_v23, %v2427_v54  ;;  %2334 = vmatprep.subr.mxu0 %v2581_v49  ;;  %v1464_v28 = vpop.permute.xlu0 %1463 }
 0x429   :  { %2322 = vmatmul.mubr.msk.f32.vlgmr.msra.gmra.mrb[14].mxu1 %vm457_vm2, %v1152_v50 }
 0x42a   :  { %2330 = vmatpush3.msra.mxu1 %v1388_v17  ;;  %2331 = vmatprep.mubr.msk.f32.mxu1 %vm2582_vm1, %v2581_v49 }
 0x42b   :  { %2339 = vmatprep.subr.mxu1 %v2581_v49 }
 0x42e   :  { %v2445_v48 = vpop.eup %2444 }
 0x42f   :  { %v1154_v24 = vmul.f32 %v2445_v48, %v2785_v57 }
 0x431   :  { %2332 = vmatmul.mubr.msk.f32.vlgmr.msra.gmra.mrb[16].mxu1 %vm457_vm2, %v1154_v24 }
 0x432   :  { %2340 = vmatpush3.msra.mxu1 %v1540_v25  ;;  %2341 = vmatprep.mubr.msk.f32.mxu1 %vm2582_vm1, %v2581_v49 }
 0x433   :  { %2349 = vmatprep.subr.mxu1 %v2581_v49 }
 0x44c   :  { %v1127_v26 = vpop.xlane.xlu1 %1126 }
 0x44d   :  { %2446 = vrcp.f32 %v1127_v26 }
 0x450   :  { %v1133_v27 = vpop.xlane.xlu1 %1132 }
 0x451   :  { %2448 = vrcp.f32 %v1133_v27 }
 0x457   :  { %v2447_v29 = vpop.eup %2446 }
 0x458   :  { %v1153_v30 = vmul.f32 %v2447_v29, %v2431_v6  ;;  %v1139_v31 = vpop.xlane.xlu1 %1138  ;;  %v1136_v32 = vpop.xlane.xlu0 %1135 }
 0x459   :  { %2450 = vrcp.f32 %v1139_v31 }
 0x45a   :  { %2452 = vrcp.f32 %v1136_v32  ;;  %2327 = vmatmul.mubr.msk.f32.vlgmr.msra.gmra.mrb[12].mxu0 %vm457_vm2, %v1153_v30 }
 0x45b   :  { %v2449_v33 = vpop.eup %2448  ;;  %2335 = vmatpush3.msra.mxu0 %v1464_v28  ;;  %2336 = vmatprep.mubr.msk.f32.mxu0 %vm2582_vm1, %v2581_v49 }
 0x45c   :  { %v1155_v35 = vmul.f32 %v2449_v33, %v2433_v10  ;;  %2344 = vmatprep.subr.mxu0 %v2581_v49  ;;  %v1142_v36 = vpop.xlane.xlu0 %1141  ;;  %v1692_v46 = vpop.permute.xlu1 %1691 }
 0x45d   :  { %2454 = vrcp.f32 %v1142_v36 }
 0x45e   :  { %2337 = vmatmul.mubr.msk.f32.vlgmr.msra.gmra.mrb[14].mxu0 %vm457_vm2, %v1155_v35 }
 0x45f   :  { %2346 = vmatprep.mubr.msk.f32.mxu0 %vm2582_vm1, %v2581_v49 }
 0x460   :  { %v1616_v38 = vpop.permute.xlu0 %1615 }
 0x461   :  { %2345 = vmatpush3.msra.mxu0 %v1616_v38 }
 0x462   :  { %2354 = vmatprep.subr.mxu0 %v1767_v39 }
 0x463   :  { %v2451_v40 = vpop.eup %2450 }
 0x464   :  { %v2453_v41 = vpop.eup %2452  ;;  %v1157_v43 = vmul.f32 %v2451_v40, %v2437_v12 }
 0x465   :  { %v1156_v45 = vmul.f32 %v2453_v41, %v2796_v11 }
 0x466   :  { %2347 = vmatmul.mubr.msk.f32.vlgmr.msra.gmra.mrb[16].mxu0 %vm457_vm2, %v1157_v43 }
 0x467   :  { %2342 = vmatmul.mubr.msk.f32.vlgmr.msra.gmra.mrb[18].mxu1 %vm457_vm2, %v1156_v45  ;;  %v2455_v47 = vpop.eup %2454  ;;  %2355 = vmatpush3.msra.mxu0 %v1767_v39 }
 0x468   :  { %2350 = vmatpush3.msra.mxu1 %v1692_v46  ;;  %2351 = vmatprep.mubr.msk.f32.mxu1 %vm2582_vm1, %v2581_v49  ;;  %v1158_v51 = vmul.f32 %v2455_v47, %v2801_v15 }
 0x469   :  { %2359 = vmatprep.subr.mxu0 %v1768_v52 }
 0x46b   :  { %2352 = vmatmul.mubr.msk.f32.vlgmr.msra.gmra.mrb[20].mxu1 %vm457_vm2, %v1158_v51 }
 0x4f8   :  { %v1231_v53 = vpop.f32.mrb[10].mxu0 }
 0x4f9   :  { %v2318_v34 = vpop.f32.mrb[11].mxu0  ;;  %2356 = vmatprep.mubr.msk.f32.mxu0 %vm457_vm2, %v1231_v53 }
 0x4fc   :  { %v1307_v54 = vpop.f32.mrb[14].mxu1 }
 0x4fd   :  { %v2323_v42 = vpop.f32.mrb[15].mxu1  ;;  %2357 = vmatmul.mubr.msk.f32.vlgmr.msra.gmra.mrb[18].mxu0 %vm457_vm2, %v1307_v54 }
 0x4fe   :  { %2360 = vmatpush3.msra.mxu0 %v1768_v52 }
 0x4ff   :  { %2364 = vmatprep.subr.mxu0 %v1769_v55 }
 0x504   :  { %v1459_v49 = vpop.f32.mrb[16].mxu1 }
 0x505   :  { %v2333_v56 = vpop.f32.mrb[17].mxu1 }
 0x52d   :  { %v1383_v57 = vpop.f32.mrb[12].mxu0 }
 0x52e   :  { %v2328_v58 = vpop.f32.mrb[13].mxu0  ;;  %2361 = vmatprep.mubr.msk.f32.mxu0 %vm457_vm2, %v1383_v57 }
 0x52f   :  { %2362 = vmatmul.mubr.msk.f32.vlgmr.msra.gmra.mrb[18].mxu0 %vm457_vm2, %v1459_v49 }
 0x530   :  { %2365 = vmatpush3.msra.mxu0 %v1769_v55 }
 0x531   :  { %v1535_v60 = vpop.f32.mrb[14].mxu0  ;;  %2369 = vmatprep.subr.mxu0 %v1770_v59 }
 0x532   :  { %v2338_v61 = vpop.f32.mrb[15].mxu0  ;;  %2366 = vmatprep.mubr.msk.f32.mxu0 %vm457_vm2, %v1535_v60 }
 0x539   :  { %v1687_v62 = vpop.f32.mrb[16].mxu0 }
 0x53a   :  { %v1611_v63 = vpop.f32.mrb[18].mxu1  ;;  %v2348_v0 = vpop.f32.mrb[17].mxu0 }
 0x53b   :  { %v2343_v1 = vpop.f32.mrb[19].mxu1  ;;  %2367 = vmatmul.mubr.msk.f32.vlgmr.msra.gmra.mrb[18].mxu0 %vm457_vm2, %v1611_v63 }
 0x53c   :  { %2370 = vmatpush3.msra.mxu0 %v1770_v59  ;;  %2371 = vmatprep.mubr.msk.f32.mxu0 %vm457_vm2, %v1687_v62 }
 0x53e   :  { %v1763_v2 = vpop.f32.mrb[20].mxu1 }
 0x53f   :  { %v2353_v3 = vpop.f32.mrb[21].mxu1 }
 0x543   :  { %2372 = vmatmul.mubr.msk.f32.vlgmr.msra.gmra.mrb[18].mxu0 %vm457_vm2, %v1763_v2 }
 0x616   :  { %v2373_v4 = vpop.f32.mrb[18].mxu0 }
 0x617   :  { %2102 = vst.msk [vmem:[#allocation10 + $0x8] sm:$0xff] %vm91_vm0, %v2373_v4  ;;  %v2086_v5 = vpop.f32.mrb[19].mxu0 }
 0x618   :  { %2101 = vst.msk [vmem:[#allocation10] sm:$0xff] %vm91_vm0, %v2086_v5 }
 0x619   :  { %2555 = shalt.err (!%p2552_p8)
}
 0x61a   :  { %s2556_s19 = scalar_lea.hbm %s2865_s4, 256 }
 0x61b   :  { %p2557_p9 = scmp.ne.s32.totalorder %s2865_s4, %s2556_s19  ;;  %p2560_p10 = scmp.lt.u32.totalorder %s2556_s19, %s2865_s4 }
 0x61d   :  { %p2562_p11 = pnand %p2560_p10, %p2557_p9 }
 0x61f   :  { %2565 = shalt.err (!%p2562_p11)
}
 0x620   :  { %2114 = dma.vmem_to_hbm [thread:$0]  %s2109_s14, 256, %s2865_s4, [#allocation4], %s2576_s27, %s2576_s27, %s2577_s28  }
 0x621   :  { %2572 = dma.done.wait [#allocation4], 256  }
 0x622   :  { %2573 = vsyncadd [#allocation4], 4294967040 }
 0x623   :  { %2118 = vsyncpa [#allocation3], 1 }
 0x624   :  { %2119 = vsyncpa [#allocation6], 1 }
 0x625   :  { %2120 = vsyncpa [#allocation9], 1 }
 0x626   :  { %2121 = vsyncpa [#allocation4], 1 }

</bundles_post_ra>
